<compile_context>
chip_gen: v6e
topology: v6e:2x2x1
jax: 0.10.0
libtpu: 0.0.40
codegen_flags: <defaults>
</compile_context>

<pallas_src>
from functools import lru_cache, partial

import numpy as np
import jax
import jax.numpy as jnp
from jax import lax
from jax.experimental import pallas as pl
from jax.experimental.pallas import tpu as pltpu


# ----------------------------- helper matrices (host side) -------------------

def adaptive_pool_matrix(n: int, g: int) -> np.ndarray:
    """Row-stochastic (g, n) matrix replicating F.adaptive_avg_pool1d bins."""
    P = np.zeros((g, n), dtype=np.float32)
    for i in range(g):
        s = (i * n) // g
        e = -((-(i + 1) * n) // g)          # ceil((i+1)*n/g)
        P[i, s:e] = 1.0 / float(e - s)
    return P


def bilinear_matrix(n_out: int, n_in: int) -> np.ndarray:
    """(n_out, n_in) matrix replicating F.interpolate bilinear, align_corners=False."""
    M = np.zeros((n_out, n_in), dtype=np.float32)
    scale = n_in / n_out
    for y in range(n_out):
        src = scale * (y + 0.5) - 0.5
        src = max(src, 0.0)
        i0 = min(int(np.floor(src)), n_in - 1)
        i1 = min(i0 + 1, n_in - 1)
        l1 = min(max(src - i0, 0.0), 1.0)
        M[y, i0] += 1.0 - l1
        M[y, i1] += l1
    return M


@lru_cache(maxsize=None)
def _pool_interp_matrices(h: int, w: int, g: int):
    """Cached (P, M^T), both shaped (g*g, h*w) so the lane axis is h*w (dense)."""
    Ph, Pw = adaptive_pool_matrix(h, g), adaptive_pool_matrix(w, g)
    P = (Ph[:, None, :, None] * Pw[None, :, None, :]).reshape(g * g, h * w)
    Mh, Mw = bilinear_matrix(h, g), bilinear_matrix(w, g)
    M = (Mh[:, None, :, None] * Mw[None, :, None, :]).reshape(h * w, g * g)
    MT = np.ascontiguousarray(M.T)                      # (g*g, h*w)
    return jnp.asarray(P), jnp.asarray(MT)


# ------------------------------ static tiling choices ------------------------

def _pick_block_batch(B: int, C: int, HW: int, itemsize: int) -> int:
    """Samples per grid step: block ~<=4 MiB, >=2 grid steps, sublane-aligned."""
    per_sample = C * HW * itemsize
    target = 4 << 20
    best = 1
    for bb in range(1, B + 1):
        if B % bb:
            continue
        if bb > 1 and B // bb < 2:          # keep >=2 grid steps (v7x megacore)
            continue
        if (bb * C) % 8 != 0 and bb != B:   # BlockSpec sublane constraint
            continue
        if bb * per_sample > target:
            continue
        if bb > 16:                         # bound fc1/fc2 unroll
            continue
        best = bb
    if (best * C) % 8 != 0 and best != B:
        best = B
    return best


def _pick_hw_chunk(HW: int) -> int:
    """Lane-dense chunk for the streamed upsample+gate (multiple of 128)."""
    target = 2048
    if HW <= target or HW % 128 != 0:
        return HW
    best = HW
    for k in range(1, HW // 128 + 1):
        c = 128 * k
        if c > target:
            break
        if HW % c == 0:
            best = c
    return best


# --------------------------------- Pallas kernel -----------------------------

def se_local_kernel(x_ref, p_ref, mt_ref, w1_ref, b1_ref, w2_ref, b2_ref, o_ref,
                    *, bb, C, hw_chunk, n_chunks):
    # x_ref : (bb*C, HW)   p_ref/mt_ref: (gg, HW)
    # w1_ref: (Cm, C)      b1_ref: (Cm, 1)
    # w2_ref: (C, Cm)      b2_ref: (C, 1)
    gg = p_ref.shape[0]
    rows = bb * C

    # ---- adaptive average pool: accumulate (rows, gg) over lane-dense HW
    # chunks; x stays in its input dtype, accumulation is f32 on the MXU.
    pooled = jnp.zeros((rows, gg), jnp.float32)
    for c in range(n_chunks):
        off = c * hw_chunk
        pooled = pooled + lax.dot_general(
            x_ref[:, off:off + hw_chunk], p_ref[:, off:off + hw_chunk],
            dimension_numbers=(((1,), (1,)), ((), ())),
            preferred_element_type=jnp.float32)

    # ---- tiny per-sample fc1(relu) / fc2(sigmoid) (1x1 convs)
    se_rows = []
    for s in range(bb):
        p_s = pooled[s * C:(s + 1) * C, :]                       # (C, gg)
        h1 = jnp.dot(w1_ref[...], p_s,
                     preferred_element_type=jnp.float32) + b1_ref[...]
        h1 = jnp.maximum(h1, 0.0)
        logit = jnp.dot(w2_ref[...], h1,
                        preferred_element_type=jnp.float32) + b2_ref[...]
        se_rows.append(jax.nn.sigmoid(logit))                    # (C, gg)
    se = se_rows[0] if bb == 1 else jnp.concatenate(se_rows, axis=0)  # (rows, gg)

    # ---- bilinear upsample + gate, streamed per HW chunk (no full f32
    # (rows, HW) intermediate; stores stay lane-dense).
    for c in range(n_chunks):
        off = c * hw_chunk
        se_chunk = jnp.dot(se, mt_ref[:, off:off + hw_chunk],
                           preferred_element_type=jnp.float32)   # (rows, hw_chunk)
        x_chunk = x_ref[:, off:off + hw_chunk]
        o_ref[:, off:off + hw_chunk] = (
            x_chunk * se_chunk.astype(x_chunk.dtype)).astype(o_ref.dtype)


# --------------------------------- wrapper -----------------------------------

def auto_adaptive_se_local(x_nchw, w1, b1, w2, b2):
    """x_nchw: (B, C, H, W).  w1: (Cm, C, 1, 1), b1: (Cm,),
    w2: (C, Cm, 1, 1), b2: (C,).  Returns (B, C, H, W) in x.dtype."""
    B, C, H, W = x_nchw.shape
    Cm = w1.shape[0]
    g = 2 if min(H, W) <= 7 else 4
    gg, HW = g * g, H * W

    P, MT = _pool_interp_matrices(H, W, g)              # cached host-side

    itemsize = np.dtype(x_nchw.dtype).itemsize
    bb = _pick_block_batch(B, C, HW, itemsize)
    hw_chunk = _pick_hw_chunk(HW)
    n_chunks = HW // hw_chunk
    rows = bb * C
    n_blocks = B // bb

    # Free reshapes only -- channel-first layout kept throughout (no transposes).
    x_flat = x_nchw.reshape(B * C, HW)
    w1m = w1.reshape(Cm, C)
    w2m = w2.reshape(C, Cm)
    b1c = b1.reshape(Cm, 1)
    b2c = b2.reshape(C, 1)

    blk_bytes = rows * HW * itemsize
    const_bytes = (2 * gg * HW + 2 * C * Cm + Cm + C) * 4
    chunk_bytes = rows * hw_chunk * 4                   # f32 se/gate chunk
    # x + out blocks double-buffered, constants double-buffered, chunked f32
    # intermediates, plus headroom for compiler scratch.
    vmem_needed = 4 * blk_bytes + 2 * const_bytes + 2 * chunk_bytes + (8 << 20)
    try:
        vmem_cap = int(pltpu.get_tpu_info().vmem_capacity_bytes)
    except Exception:                                   # conservative fallback (v7x)
        vmem_cap = 64 << 20
    vmem_limit = int(min(max(vmem_needed, 32 << 20), vmem_cap - (8 << 20)))

    cost = pl.CostEstimate(
        flops=int(B * (2 * C * HW * gg          # pool
                       + 2 * Cm * C * gg        # fc1
                       + 2 * C * Cm * gg        # fc2
                       + 2 * C * gg * HW        # upsample
                       + C * HW)),              # gate
        transcendentals=int(B * C * gg),
        bytes_accessed=int(2 * B * C * HW * itemsize + const_bytes),
    )

    grid_spec = pltpu.PrefetchScalarGridSpec(
        num_scalar_prefetch=0,
        grid=(n_blocks,),
        in_specs=[
            pl.BlockSpec((rows, HW), lambda i: (i, 0)),   # x block (bb samples)
            pl.BlockSpec((gg, HW), lambda i: (0, 0)),     # P   (constant index)
            pl.BlockSpec((gg, HW), lambda i: (0, 0)),     # M^T (constant index)
            pl.BlockSpec((Cm, C), lambda i: (0, 0)),      # w1
            pl.BlockSpec((Cm, 1), lambda i: (0, 0)),      # b1
            pl.BlockSpec((C, Cm), lambda i: (0, 0)),      # w2
            pl.BlockSpec((C, 1), lambda i: (0, 0)),       # b2
        ],
        out_specs=pl.BlockSpec((rows, HW), lambda i: (i, 0)),
    )

    kernel = partial(se_local_kernel, bb=bb, C=C, hw_chunk=hw_chunk,
                     n_chunks=n_chunks)

    out_flat = pl.pallas_call(
        kernel,
        out_shape=jax.ShapeDtypeStruct((B * C, HW), x_nchw.dtype),
        grid_spec=grid_spec,
        compiler_params=pltpu.CompilerParams(
            dimension_semantics=("parallel",),
            vmem_limit_bytes=vmem_limit),
        cost_estimate=cost,
    )(x_flat, P, MT, w1m, b1c, w2m, b2c)

    return out_flat.reshape(B, C, H, W)


# --------------------------------- reference ---------------------------------

def reference(x_nchw, w1, b1, w2, b2):
    """Pure-JAX reference with identical pooling/interp semantics (NHWC path)."""
    B, C, H, W = x_nchw.shape
    Cm = w1.shape[0]
    g = 2 if min(H, W) <= 7 else 4
    Ph, Pw = adaptive_pool_matrix(H, g), adaptive_pool_matrix(W, g)
    P = jnp.asarray((Ph[:, None, :, None] * Pw[None, :, None, :]).reshape(g * g, H * W))
    Mh, Mw = bilinear_matrix(H, g), bilinear_matrix(W, g)
    M = jnp.asarray((Mh[:, None, :, None] * Mw[None, :, None, :]).reshape(H * W, g * g))

    x_flat = jnp.transpose(x_nchw, (0, 2, 3, 1)).reshape(B, H * W, C).astype(jnp.float32)
    pooled = jnp.einsum("ph,bhc->bpc", P, x_flat)
    h1 = jax.nn.relu(pooled @ w1.reshape(Cm, C).T + b1[None, None, :])
    se = jax.nn.sigmoid(h1 @ w2.reshape(C, Cm).T + b2[None, None, :])
    se_full = jnp.einsum("hp,bpc->bhc", M, se)
    out = x_flat * se_full
    return jnp.transpose(out.reshape(B, H, W, C), (0, 3, 1, 2)).astype(x_nchw.dtype)


# ----------------------------------- main ------------------------------------

if __name__ == "__main__":
    B, C, H, W = 2, 32, 16, 16          # min(H,W)=16 > 7 -> grid_size = 4
    reduction = 16
    Cm = C // reduction                 # 2

    key = jax.random.PRNGKey(0)
    kx, k1, k2, k3, k4 = jax.random.split(key, 5)
    x = jax.random.normal(kx, (B, C, H, W), dtype=jnp.float32)
    w1 = 0.1 * jax.random.normal(k1, (Cm, C, 1, 1), dtype=jnp.float32)
    b1 = 0.1 * jax.random.normal(k2, (Cm,), dtype=jnp.float32)
    w2 = 0.1 * jax.random.normal(k3, (C, Cm, 1, 1), dtype=jnp.float32)
    b2 = 0.1 * jax.random.normal(k4, (C,), dtype=jnp.float32)

    out = jax.block_until_ready(auto_adaptive_se_local(x, w1, b1, w2, b2))
    ref = jax.block_until_ready(reference(x, w1, b1, w2, b2))

    assert out.shape == (B, C, H, W)
    assert out.dtype == x.dtype
    np.testing.assert_allclose(np.asarray(out), np.asarray(ref), rtol=1e-5, atol=1e-5)

    print("KERNEL_OK")
</pallas_src>

<mosaic_0001>
module attributes {stable_mosaic.version = 11 : i64} {
  func.func @se_local_kernel(%arg0: i32, %arg1: memref<32x256xf32, #tpu.memory_space<vmem>>, %arg2: memref<16x256xf32, #tpu.memory_space<vmem>>, %arg3: memref<16x256xf32, #tpu.memory_space<vmem>>, %arg4: memref<2x32xf32, #tpu.memory_space<vmem>>, %arg5: memref<2x1xf32, #tpu.memory_space<vmem>>, %arg6: memref<32x2xf32, #tpu.memory_space<vmem>>, %arg7: memref<32x1xf32, #tpu.memory_space<vmem>>, %arg8: memref<32x256xf32, #tpu.memory_space<vmem>>) attributes {dimension_semantics = [#tpu.dimension_semantics<parallel>], iteration_bounds = array<i64: 2>, scalar_prefetch = 0 : i64, scratch_operands = 0 : i64, tpu.core_type = #tpu.core_type<tc>, window_params = [{transform_indices = @transform_0, window_bounds = array<i64: 32, 256>}, {pipeline_mode = #tpu.pipeline_mode<synchronous>, transform_indices = @transform_1, window_bounds = array<i64: 16, 256>}, {pipeline_mode = #tpu.pipeline_mode<synchronous>, transform_indices = @transform_2, window_bounds = array<i64: 16, 256>}, {pipeline_mode = #tpu.pipeline_mode<synchronous>, transform_indices = @transform_3, window_bounds = array<i64: 2, 32>}, {pipeline_mode = #tpu.pipeline_mode<synchronous>, transform_indices = @transform_4, window_bounds = array<i64: 2, 1>}, {pipeline_mode = #tpu.pipeline_mode<synchronous>, transform_indices = @transform_5, window_bounds = array<i64: 32, 2>}, {pipeline_mode = #tpu.pipeline_mode<synchronous>, transform_indices = @transform_6, window_bounds = array<i64: 32, 1>}, {transform_indices = @transform_7, window_bounds = array<i64: 32, 256>}]} {
    %cst = arith.constant 0.000000e+00 : f32
    %0 = vector.broadcast %cst : f32 to vector<32x16xf32>
    %c0 = arith.constant 0 : index
    %c0_0 = arith.constant 0 : index
    %1 = vector.load %arg1[%c0, %c0_0] : memref<32x256xf32, #tpu.memory_space<vmem>>, vector<32x256xf32>
    %c0_1 = arith.constant 0 : index
    %c0_2 = arith.constant 0 : index
    %2 = vector.load %arg2[%c0_1, %c0_2] : memref<16x256xf32, #tpu.memory_space<vmem>>, vector<16x256xf32>
    %cst_3 = arith.constant dense<0.000000e+00> : vector<32x16xf32>
    %3 = tpu.matmul %1, %2, %cst_3 {dimension_numbers = #tpu.dot_dimension_numbers<[1], [1], [0], [0], [0, 0, 1, 0], [], []>} : vector<32x256xf32>, vector<16x256xf32>, vector<32x16xf32> -> vector<32x16xf32>
    %4 = arith.addf %0, %3 : vector<32x16xf32>
    %c0_4 = arith.constant 0 : index
    %c0_5 = arith.constant 0 : index
    %5 = vector.load %arg4[%c0_4, %c0_5] : memref<2x32xf32, #tpu.memory_space<vmem>>, vector<2x32xf32>
    %cst_6 = arith.constant dense<0.000000e+00> : vector<2x16xf32>
    %6 = tpu.matmul %5, %4, %cst_6 {dimension_numbers = #tpu.dot_dimension_numbers<[1], [0], [0], [1], [0, 0, 1, 1], [], []>} : vector<2x32xf32>, vector<32x16xf32>, vector<2x16xf32> -> vector<2x16xf32>
    %c0_7 = arith.constant 0 : index
    %c0_8 = arith.constant 0 : index
    %7 = vector.load %arg5[%c0_7, %c0_8] : memref<2x1xf32, #tpu.memory_space<vmem>>, vector<2x1xf32>
    %8 = vector.broadcast %7 : vector<2x1xf32> to vector<2x16xf32>
    %9 = arith.addf %6, %8 : vector<2x16xf32>
    %cst_9 = arith.constant 0.000000e+00 : f32
    %10 = vector.broadcast %cst_9 : f32 to vector<2x16xf32>
    %11 = arith.maximumf %9, %10 : vector<2x16xf32>
    %c0_10 = arith.constant 0 : index
    %c0_11 = arith.constant 0 : index
    %12 = vector.load %arg6[%c0_10, %c0_11] : memref<32x2xf32, #tpu.memory_space<vmem>>, vector<32x2xf32>
    %cst_12 = arith.constant dense<0.000000e+00> : vector<32x16xf32>
    %13 = tpu.matmul %12, %11, %cst_12 {dimension_numbers = #tpu.dot_dimension_numbers<[1], [0], [0], [1], [0, 0, 1, 1], [], []>} : vector<32x2xf32>, vector<2x16xf32>, vector<32x16xf32> -> vector<32x16xf32>
    %c0_13 = arith.constant 0 : index
    %c0_14 = arith.constant 0 : index
    %14 = vector.load %arg7[%c0_13, %c0_14] : memref<32x1xf32, #tpu.memory_space<vmem>>, vector<32x1xf32>
    %15 = vector.broadcast %14 : vector<32x1xf32> to vector<32x16xf32>
    %16 = arith.addf %13, %15 : vector<32x16xf32>
    %17 = arith.negf %16 : vector<32x16xf32>
    %18 = math.exp %17 : vector<32x16xf32>
    %cst_15 = arith.constant 1.000000e+00 : f32
    %19 = vector.broadcast %cst_15 : f32 to vector<32x16xf32>
    %20 = arith.addf %19, %18 : vector<32x16xf32>
    %21 = arith.divf %19, %20 : vector<32x16xf32>
    %c0_16 = arith.constant 0 : index
    %c0_17 = arith.constant 0 : index
    %22 = vector.load %arg3[%c0_16, %c0_17] : memref<16x256xf32, #tpu.memory_space<vmem>>, vector<16x256xf32>
    %cst_18 = arith.constant dense<0.000000e+00> : vector<32x256xf32>
    %23 = tpu.matmul %21, %22, %cst_18 {dimension_numbers = #tpu.dot_dimension_numbers<[1], [0], [0], [1], [0, 0, 1, 1], [], []>} : vector<32x16xf32>, vector<16x256xf32>, vector<32x256xf32> -> vector<32x256xf32>
    %c0_19 = arith.constant 0 : index
    %c0_20 = arith.constant 0 : index
    %24 = vector.load %arg1[%c0_19, %c0_20] : memref<32x256xf32, #tpu.memory_space<vmem>>, vector<32x256xf32>
    %25 = arith.mulf %24, %23 : vector<32x256xf32>
    %c0_21 = arith.constant 0 : index
    %c0_22 = arith.constant 0 : index
    %26 = vector.load %arg8[%c0_21, %c0_22] : memref<32x256xf32, #tpu.memory_space<vmem>>, vector<32x256xf32>
    tpu.vector_store %arg8[%c0_21, %c0_22], %25 {strides = array<i32>} : memref<32x256xf32, #tpu.memory_space<vmem>>, vector<32x256xf32>,
    return
  }
  func.func @transform_0(%arg0: i32) -> (i32, i32) {
    %c0_i32 = arith.constant 0 : i32
    %c0_i32_0 = arith.constant 0 : i32
    return %arg0, %c0_i32 : i32, i32
  }
  func.func @transform_1(%arg0: i32) -> (i32, i32) {
    %c0_i32 = arith.constant 0 : i32
    %c0_i32_0 = arith.constant 0 : i32
    %c0_i32_1 = arith.constant 0 : i32
    return %c0_i32, %c0_i32_0 : i32, i32
  }
  func.func @transform_2(%arg0: i32) -> (i32, i32) {
    %c0_i32 = arith.constant 0 : i32
    %c0_i32_0 = arith.constant 0 : i32
    %c0_i32_1 = arith.constant 0 : i32
    return %c0_i32, %c0_i32_0 : i32, i32
  }
  func.func @transform_3(%arg0: i32) -> (i32, i32) {
    %c0_i32 = arith.constant 0 : i32
    %c0_i32_0 = arith.constant 0 : i32
    %c0_i32_1 = arith.constant 0 : i32
    return %c0_i32, %c0_i32_0 : i32, i32
  }
  func.func @transform_4(%arg0: i32) -> (i32, i32) {
    %c0_i32 = arith.constant 0 : i32
    %c0_i32_0 = arith.constant 0 : i32
    %c0_i32_1 = arith.constant 0 : i32
    return %c0_i32, %c0_i32_0 : i32, i32
  }
  func.func @transform_5(%arg0: i32) -> (i32, i32) {
    %c0_i32 = arith.constant 0 : i32
    %c0_i32_0 = arith.constant 0 : i32
    %c0_i32_1 = arith.constant 0 : i32
    return %c0_i32, %c0_i32_0 : i32, i32
  }
  func.func @transform_6(%arg0: i32) -> (i32, i32) {
    %c0_i32 = arith.constant 0 : i32
    %c0_i32_0 = arith.constant 0 : i32
    %c0_i32_1 = arith.constant 0 : i32
    return %c0_i32, %c0_i32_0 : i32, i32
  }
  func.func @transform_7(%arg0: i32) -> (i32, i32) {
    %c0_i32 = arith.constant 0 : i32
    %c0_i32_0 = arith.constant 0 : i32
    return %arg0, %c0_i32 : i32, i32
  }
}

</mosaic_0001>

<bundles_post_ra>
// kernel: tpu_custom_call.1
= control target key start
LH: loop header
LB: loop body
LE: loop exit
PB: predicated region body
PF: predicated region fallthrough
CT: control target
= control target key end

     0   :  { %12 = vsyncpa [#allocation3], 0  ;;  %s1377_s0 = inlined_call_operand.hbm [shape: f32[64,256], index: 0, kind: input, shape index: {}]   ;;  %s1378_s1 = inlined_call_operand.vmem [shape: f32[16,256], index: 1, kind: input, shape index: {}]   ;;  %s1379_s2 = inlined_call_operand.vmem [shape: f32[16,256], index: 2, kind: input, shape index: {}]   ;;  %s1380_s3 = inlined_call_operand.vmem [shape: f32[2,32], index: 3, kind: input, shape index: {}]   ;;  %s1381_s4 = inlined_call_operand.vmem [shape: f32[2,1], index: 4, kind: input, shape index: {}]   ;;  %s1382_s5 = inlined_call_operand.vmem [shape: f32[32,2], index: 5, kind: input, shape index: {}]   ;;  %s1383_s6 = inlined_call_operand.vmem [shape: f32[32,1], index: 6, kind: input, shape index: {}]   ;;  %s1384_s7 = inlined_call_operand.hbm [shape: f32[64,256], index: 7, kind: output, shape index: {}]  }
   0x1   :  { %14 = vsyncpa [#allocation3 + $0x1], 0 }
   0x2   :  { %15 = vsyncpa [#allocation4], 0 }
   0x3   :  { %17 = vsyncpa [#allocation4 + $0x1], 0  ;;  %s1120_s24 = smov 0   ;;  %s1122_s25 = smov 0  }
   0x4   :  { %s1124_s26 = smov 0   ;;  %s1126_s27 = smov 0  }
   0x5 LB: > { %s1141_s28 = sadd.s32 4294967295, %s1069_s27   ;;  %s843_s29 = sadd.s32 4294967294, %s1069_s27   ;;  %s1069_s27 = sphi %s1126_s27, %s1399_s27   ;;  %s1065_s26 = sphi %s1124_s26, %s1398_s26   ;;  %s1061_s25 = sphi %s1122_s25, %s1397_s25   ;;  %s1057_s24 = sphi %s1120_s24, %s1396_s24  }
   0x6   : > { %s1145_s30 = sadd.s32 1, %s1069_s27   ;;  %s30_s8 = sadd.s32 1, %s1065_s26 }
   0x7   : > { %s27_s9 = ssub.s32 %s1069_s27, %s1145_s30  ;;  %p37_p0 = scmp.ne.s32.totalorder %s1065_s26, %s1061_s25 }
   0x8   : > { %p28_p1 = scmp.eq.s32.totalorder %s27_s9, 0  ;;  %p38_p2 = scmp.eq.s32.totalorder %s1069_s27, 0 }
   0x9   : > { %p43_p3 = scmp.ne.s32.totalorder %s1061_s25, %s1057_s24  ;;  %p44_p4 = scmp.eq.s32.totalorder %s1141_s28, 0 }
   0xa   : > { %s1157_s10 = scalar_select %p28_p1, %s1065_s26, %s30_s8  }
   0xb   : > { %p1159_p5 = por %p38_p2, %p37_p0  ;;  %p1163_p6 = por %p44_p4, %p43_p3 }
   0xc   : > { %p193_p7 = scmp.eq.s32.totalorder %s1141_s28, 1  ;;  %p199_p8 = scmp.eq.s32.totalorder %s843_s29, 1 }
   0xd   : > { %s1388_s12 = scalar_select %p1163_p6, 1, 0 }
   0xe   : > { %p918_p10 = scmp.lt.s32.totalorder %s1069_s27, 2  ;;  %p1170_p11 = por %p193_p7, %p37_p0 }
   0xf   : > { %p1174_p12 = por %p199_p8, %p43_p3  ;;  %s237_s15 = sand.u32 1, %s1065_s26  }
  0x10   : > { %s1389_s13 = scalar_select %p1170_p11, 1, 0 }
  0x11   : > { %s1390_s14 = scalar_select %p1174_p12, 1, 0 }
  0x12   : > { %s874_s16 = sshll.u32 %s1069_s27, 10  ;;  %s846_s17 = sshll.u32 %s237_s15, 6 }
  0x13   : > { %s1183_s20 = scalar_lea.hbm %s1377_s0, %s874_s16  ;;  %s241_s21 = scalar_lea.vmem [#allocation2], %s846_s17 }
  0x14   : > { %s249_s22 = sshll.u32 %s241_s21, 4  ;;  %p1187_p13 = pnand %p918_p10, %p1159_p5  ;;  %s1191_s22 = int_to_ptr.vmem [resolvable:$true] %s249_s22 }
  0x15   : > { %s1193_s29 = scalar_lea.sflag [#allocation3], %s237_s15  ;;  %s977_s8 = scalar_lea.hbm %s1183_s20, 1024 }
  0x16   : > { %p978_p0 = scmp.ne.s32.totalorder %s1183_s20, %s977_s8  ;;  %p979_p1 = pneg %p1187_p13 }
  0x17   : > { %s982_s17 = scalar_lea.hbm %s1377_s0, 2048  ;;  %p983_p4 = scmp.lt.s32.totalorder %s1183_s20, %s1377_s0 }
  0x18   : > { %p980_p2 = pnand %p979_p1, %p978_p0  ;;  %p984_p5 = scmp.lt.s32.totalorder %s982_s17, %s977_s8 }
  0x1a   : > { %p981_p3 = pneg %p980_p2  ;;  %p985_p7 = por %p984_p5, %p983_p4 }
  0x1c   : > { %p986_p8 = pnand %p985_p7, %p981_p3 }
  0x1e   : > { %989 = shalt.err (!%p986_p8)
}
  0x1f   : > { %s990_s15 = scalar_lea.vmem %s1191_s22, 1024  ;;  %s1071_s19 = smov [#allocation2]  }
  0x20   : > { %p991_p10 = scmp.ne.s32.totalorder %s1191_s22, %s990_s15  ;;  %s995_s21 = sshll.u32 %s1071_s19, 4  ;;  %s996_s21 = int_to_ptr.vmem [resolvable:$false] %s995_s21 }
  0x21   : > { %s997_s9 = scalar_lea.vmem %s996_s21, 2048  ;;  %p998_p2 = scmp.lt.s32.totalorder %s1191_s22, %s996_s21 }
  0x22   : > { %p993_p9 = pnand %p991_p10, %p979_p1  ;;  %p999_p12 = scmp.lt.s32.totalorder %s997_s9, %s990_s15 }
  0x24   : > { %p994_p0 = pneg %p993_p9  ;;  %p1000_p11 = por %p999_p12, %p998_p2 }
  0x26   : > { %p1001_p6 = pnand %p1000_p11, %p994_p0 }
  0x28   : > { %1004 = shalt.err (!%p1001_p6)
}
  0x29   : > { %s1072_s8 = smov 256   ;;  %s1073_s16 = smov 16  }
  0x2a   : > { %913 = dma.hbm_to_vmem [thread:$0]  (!%p1187_p13), %s1183_s20, 1024, %s1191_s22, %s1193_s29, %s1072_s8, %s1072_s8, %s1073_s16  }
  0x2b   : > { %p850_p9 = scmp.ge.s32.totalorder %s1069_s27, 1  ;;  %p257_p1 = scmp.lt.s32.totalorder %s1069_s27, 3 }
  0x2d   : > { %p258_p3 = pnand %p850_p9, %p257_p1 }
  0x2e   : > { %s1217_s17 = sand.u32 (!%p258_p3), 1, %s1061_s25   ;;  %p1392_p6 = scmp.ne.s32.totalorder (!%p258_p3), %s1388_s12, 0 }
  0x2f   : > { %261 = sbr.rel (%p258_p3) target bundleno = 925 (0x39d), region = 48  ;;  %s851_s11 = sshll.u32 (!%p258_p3), %s1217_s17, 6 }
  0x30   : > { %s264_s18 = scalar_lea.sflag (!%p258_p3), [#allocation3], %s1217_s17  ;;  %s267_s15 = scalar_lea.vmem (!%p258_p3), [#allocation2], %s851_s11 }
  0x34   : > { %1048 = dma.done.wait (%p1392_p6), %s264_s18, 1024  }
  0x35   : > { %1050 = vsyncadd (%p1392_p6), %s264_s18, 4294966272  ;;  %v311_v0 = vld [vmem:[%s1378_s1 + $0x18] sm:$0xff]  ;;  %v310_v1 = vld [vmem:[%s1378_s1 + $0x10] sm:$0xff]  ;;  %v1074_v12 = vmov 0.0   ;;  %vm1075_vm0 = vmmov 0   ;;  %v1076_v14 = vmov 0  }
  0x36   : > { %v309_v2 = vld [vmem:[%s1378_s1 + $0x8] sm:$0xff]  ;;  %340 = vmatprep.subr.mxu0 %v311_v0  ;;  %v308_v4 = vld [vmem:[%s1378_s1] sm:$0xff]  ;;  %v1244_v6 = vld [vmem:[%s267_s15 + $0x18] sm:$0xff]  ;;  %959 = vset.pattern.permute.xlu0 %v1076_v14  ;;  %vm404_vm1 = vcmask 261120   ;;  %vm507_vm2 = vcmask 15360   ;;  %vm520_vm3 = vcmask 1041408  }
  0x37   : > { %v1236_v3 = vld [vmem:[%s267_s15 + $0x8] sm:$0xff]  ;;  %341 = vmatpush1.xpose.msra.mxu0 %v310_v1  ;;  %v1242_v5 = vld [vmem:[%s267_s15] sm:$0xff]  ;;  %v1248_v7 = vld [vmem:[%s267_s15 + $0x10] sm:$0xff]  ;;  %960 = vset.pattern.permute.xlu1 %v1076_v14  ;;  %vm637_vm4 = vcmask 130048   ;;  %p1393_p12 = scmp.ne.s32.totalorder %s1389_s13, 0  ;;  %s1077_s12 = smov [#allocation5]  }
  0x38   : > { %376 = vmatprep.mubr.f32.mxu0 %v1236_v3  ;;  %342 = vmatprep.subr.mxu0 %v309_v2  ;;  %v1250_v8 = vld [vmem:[%s267_s15 + $0x28] sm:$0xff]  ;;  %v1254_v9 = vld [vmem:[%s267_s15 + $0x20] sm:$0xff]  ;;  %v1256_v10 = vld [vmem:[%s267_s15 + $0x38] sm:$0xff]  ;;  %s1009_s9 = sshll.u32 %s1077_s12, 4  ;;  %s1010_s9 = int_to_ptr.vmem [resolvable:$false] %s1009_s9 }
  0x39   : > { %v1260_v11 = vld [vmem:[%s267_s15 + $0x30] sm:$0xff]  ;;  %v398_v13 = vld [vmem:[%s1381_s4] sm:$0x3]  ;;  %v486_v16 = vld [vmem:[%s1383_s6 + $0x18] sm:$0xff]  ;;  %s297_s15 = scalar_lea.vmem [#allocation5], %s851_s11  ;;  %s876_s11 = sshll.u32 %s1141_s28, 10 }
  0x3a   : > { %401 = vperm.xlu0 %959, %v398_v13   ;;  %v483_v15 = vld [vmem:[%s1383_s6] sm:$0xff]  ;;  %v484_v27 = vld [vmem:[%s1383_s6 + $0x8] sm:$0xff]  ;;  %v485_v28 = vld [vmem:[%s1383_s6 + $0x10] sm:$0xff]  ;;  %s770_s22 = sshll.u32 %s297_s15, 4  ;;  %s1333_s19 = scalar_lea.hbm %s1384_s7, %s876_s11  ;;  %s1327_s22 = int_to_ptr.vmem [resolvable:$true] %s770_s22 }
  0x3b   : > { %343 = vmatpush1.xpose.msra.mxu0 %v308_v4  ;;  %v397_v25 = vld [vmem:[%s1380_s3] sm:$0x3]  ;;  %494 = vperm.xlu1 %960, %v484_v27   ;;  %v480_v34 = vld [vmem:[%s1382_s5 + $0x8] sm:$0xff]  ;;  %v481_v35 = vld [vmem:[%s1382_s5 + $0x10] sm:$0xff]  ;;  %s756_s28 = scalar_lea.sflag [#allocation4], %s1217_s17  ;;  %s1005_s21 = scalar_lea.vmem %s1327_s22, 1024 }
  0x3c   : > { %887 = vmatprep.subr.mxu0 %v1074_v12  ;;  %v479_v26 = vld [vmem:[%s1382_s5] sm:$0xff]  ;;  %v482_v36 = vld [vmem:[%s1382_s5 + $0x18] sm:$0xff]  ;;  %v635_v38 = vld [vmem:[%s1379_s2 + $0x10] sm:$0xff]  ;;  %p1006_p11 = scmp.ne.s32.totalorder %s1327_s22, %s1005_s21  ;;  %s1011_s8 = scalar_lea.vmem %s1010_s9, 2048 }
  0x3d   : > { %900 = vmatprep.mubr.msk.f32.mxu1 %vm507_vm2, %v479_v26  ;;  %v636_v37 = vld [vmem:[%s1379_s2 + $0x18] sm:$0xff]  ;;  %v634_v39 = vld [vmem:[%s1379_s2 + $0x8] sm:$0xff]  ;;  %v633_v40 = vld [vmem:[%s1379_s2] sm:$0xff]  ;;  %p1012_p5 = scmp.lt.s32.totalorder %s1327_s22, %s1010_s9  ;;  %p1013_p7 = scmp.lt.s32.totalorder %s1011_s8, %s1005_s21 }
  0x3e   : > { %377 = vmatmul.mubr.f32.vlgmr.msra.gmra.mxu0 %v1242_v5  ;;  %489 = vperm.xlu0 %959, %v483_v15   ;;  %p1007_p13 = pnand %p1006_p11, %p1393_p12 }
  0x3f   : > { %381 = vmatprep.mubr.f32.mxu0 %v1244_v6  ;;  %499 = vperm.xlu1 %960, %v485_v28   ;;  %p1014_p8 = por %p1013_p7, %p1012_p5 }
  0x40   : > { %p1008_p4 = pneg %p1007_p13 }
  0x42   : > { %382 = vmatmul.mubr.f32.gmra.mxu0 %v1248_v7  ;;  %504 = vperm.xlu0 %959, %v486_v16   ;;  %p1015_p10 = pnand %p1014_p8, %p1008_p4 }
  0x43   : > { %386 = vmatprep.mubr.f32.mxu0 %v1250_v8 }
  0x46   : > { %387 = vmatmul.mubr.f32.gmra.mxu0 %v1254_v9 }
  0x47   : > { %391 = vmatprep.mubr.f32.mxu0 %v1256_v10 }
  0x4a   : > { %392 = vmatmul.mubr.f32.gmra.mxu0 %v1260_v11 }
  0x4b   : > { %895 = vmatprep.mubr.msk.f32.mxu0 %vm1075_vm0, %v1074_v12 }
  0xb5   : > { %v402_v29 = vpop.permute.xlu0 %401 }
  0xb6   : > { %v495_v41 = vpop.permute.xlu1 %494 }
  0xb9   : > { %v490_v42 = vpop.permute.xlu0 %489 }
  0xba   : > { %v500_v49 = vpop.permute.xlu1 %499 }
  0xbd   : > { %v505_v51 = vpop.permute.xlu0 %504 }
  0xfe   : > { %v378_v17 = vpop.f32.mrf.mxu0 }
 0x100   : > { %v380_v18 = vpop.f32.mrf.mxu0 }
 0x102   : > { %v383_v19 = vpop.f32.mrf.mxu0 }
 0x104   : > { %v385_v20 = vpop.f32.mrf.mxu0 }
 0x106   : > { %v388_v21 = vpop.f32.mrf.mxu0 }
 0x108   : > { %v390_v22 = vpop.f32.mrf.mxu0 }
 0x10a   : > { %v393_v23 = vpop.f32.mrf.mxu0 }
 0x10b   : > { %888 = vmatpush3.msra.mxu0 %v393_v23 }
 0x10c   : > { %v395_v24 = vpop.f32.mrf.mxu0  ;;  %889 = vmatprep.subr.mxu0 %v1074_v12 }
 0x10d   : > { %890 = vmatpush3.msra.mxu0 %v388_v21 }
 0x10e   : > { %891 = vmatprep.subr.mxu0 %v1074_v12 }
 0x10f   : > { %892 = vmatpush3.msra.mxu0 %v383_v19 }
 0x110   : > { %893 = vmatprep.subr.mxu0 %v1074_v12 }
 0x111   : > { %894 = vmatpush3.msra.mxu0 %v378_v17 }
 0x112   : > { %896 = vmatmul.mubr.msk.f32.vlgmr.msra.gmra.mxu0 %vm404_vm1, %v397_v25 }
 0x1d2   : > { %v474_v30 = vpop.f32.mrf.mxu0 }
 0x1d3   : > { %v475_v31 = vadd.f32 %v474_v30, %v402_v29 }
 0x1d4   : > { %v897_v32 = vpop.f32.mrf.mxu0 }
 0x1d5   : > { %v478_v33 = vmax.f32 %v475_v31, 0.0 }
 0x1d7   : > { %898 = vmatprep.subr.msk.mxu1 %vm520_vm3, %v478_v33 }
 0x1d8   : > { %899 = vmatpush3.msk.msra.mxu1 %vm520_vm3, %v478_v33 }
 0x1d9   : > { %901 = vmatmul.mubr.msk.f32.vlgmr.msra.gmra.mxu1 %vm507_vm2, %v480_v34  ;;  %678 = vmatprep.subr.mxu1 %v636_v37 }
 0x1da   : > { %903 = vmatprep.mubr.msk.f32.mxu1 %vm507_vm2, %v481_v35  ;;  %679 = vmatpush1.msra.mxu1 %v635_v38 }
 0x1db   : > { %680 = vmatprep.subr.mxu1 %v634_v39 }
 0x1dc   : > { %681 = vmatpush1.msra.mxu1 %v633_v40 }
 0x1dd   : > { %904 = vmatmul.mubr.msk.f32.gmra.mxu1 %vm507_vm2, %v482_v36 }
 0x1de   : > { %714 = vmatprep.mubr.f32.mxu1 %v1074_v12 }
 0x299   : > { %v902_v43 = vpop.f32.mrf.mxu1 }
 0x29a   : > { %v596_v44 = vadd.f32 %v902_v43, %v495_v41 }
 0x29b   : > { %v590_v45 = vpop.f32.mrf.mxu1 }
 0x29c   : > { %v591_v46 = vadd.f32 %v590_v45, %v490_v42  ;;  %v860_v47 = vmul.f32 -1.442695, %v596_v44 }
 0x29d   : > { %v905_v48 = vpop.f32.mrf.mxu1 }
 0x29e   : > { %v859_v50 = vmul.f32 -1.442695, %v591_v46  ;;  %961 = vpow2.f32 %v860_v47  ;;  %v606_v53 = vadd.f32 %v905_v48, %v505_v51 }
 0x29f   : > { %v600_v52 = vpop.f32.mrf.mxu1 }
 0x2a0   : > { %963 = vpow2.f32 %v859_v50  ;;  %v601_v54 = vadd.f32 %v600_v52, %v500_v49  ;;  %v862_v56 = vmul.f32 -1.442695, %v606_v53 }
 0x2a2   : > { %v861_v55 = vmul.f32 -1.442695, %v601_v54 }
 0x2a4   : > { %965 = vpow2.f32 %v861_v55 }
 0x2a5   : > { %967 = vpow2.f32 %v862_v56 }
 0x2ab   : > { %v962_v57 = vpop.eup %961 }
 0x2ac   : > { %v622_v60 = vadd.f32 1.0, %v962_v57 }
 0x2ad   : > { %v964_v58 = vpop.eup %963 }
 0x2ae   : > { %v621_v59 = vadd.f32 1.0, %v964_v58 }
 0x2b0   : > { %969 = vrcp.f32 %v621_v59 }
 0x2b1   : > { %v966_v61 = vpop.eup %965  ;;  %971 = vrcp.f32 %v622_v60 }
 0x2b2   : > { %v623_v62 = vadd.f32 1.0, %v966_v61  ;;  %v968_v63 = vpop.eup %967 }
 0x2b3   : > { %v624_v0 = vadd.f32 1.0, %v968_v63 }
 0x2b4   : > { %973 = vrcp.f32 %v623_v62 }
 0x2b5   : > { %975 = vrcp.f32 %v624_v0 }
 0x2bd   : > { %v970_v1 = vpop.eup %969 }
 0x2be   : > { %863 = vmatmul.mubr.msk.f32.vlgmr.msra.gmra.mxu1 %vm637_vm4, %v970_v1  ;;  %v972_v2 = vpop.eup %971 }
 0x2bf   : > { %720 = vmatprep.mubr.f32.mxu1 %v1074_v12 }
 0x2c1   : > { %v974_v4 = vpop.eup %973 }
 0x2c2   : > { %864 = vmatmul.mubr.msk.f32.gmra.mxu1 %vm637_vm4, %v972_v2  ;;  %v976_v13 = vpop.eup %975 }
 0x2c3   : > { %726 = vmatprep.mubr.f32.mxu1 %v1074_v12 }
 0x2c6   : > { %865 = vmatmul.mubr.msk.f32.gmra.mxu1 %vm637_vm4, %v974_v4 }
 0x2c7   : > { %732 = vmatprep.mubr.f32.mxu1 %v1074_v12 }
 0x2ca   : > { %866 = vmatmul.mubr.msk.f32.gmra.mxu1 %vm637_vm4, %v976_v13 }
 0x37e   : > { %v716_v14 = vpop.f32.mrf.mxu1 }
 0x37f   : > { %v739_v15 = vmul.f32 %v716_v14, %v1242_v5 }
 0x380   : > { %v718_v16 = vpop.f32.mrf.mxu1 }
 0x381   : > { %747 = vst [vmem:[%s297_s15] sm:$0xff] %v739_v15  ;;  %v740_v17 = vmul.f32 %v718_v16, %v1236_v3 }
 0x382   : > { %v722_v18 = vpop.f32.mrf.mxu1 }
 0x383   : > { %748 = vst [vmem:[%s297_s15 + $0x8] sm:$0xff] %v740_v17  ;;  %v741_v19 = vmul.f32 %v722_v18, %v1248_v7 }
 0x384   : > { %v724_v20 = vpop.f32.mrf.mxu1 }
 0x385   : > { %749 = vst [vmem:[%s297_s15 + $0x10] sm:$0xff] %v741_v19  ;;  %v742_v12 = vmul.f32 %v724_v20, %v1244_v6 }
 0x386   : > { %v728_v21 = vpop.f32.mrf.mxu1 }
 0x387   : > { %750 = vst [vmem:[%s297_s15 + $0x18] sm:$0xff] %v742_v12  ;;  %v743_v5 = vmul.f32 %v728_v21, %v1254_v9 }
 0x388   : > { %v730_v22 = vpop.f32.mrf.mxu1 }
 0x389   : > { %751 = vst [vmem:[%s297_s15 + $0x20] sm:$0xff] %v743_v5  ;;  %v744_v23 = vmul.f32 %v730_v22, %v1250_v8 }
 0x38a   : > { %v734_v3 = vpop.f32.mrf.mxu1 }
 0x38b   : > { %752 = vst [vmem:[%s297_s15 + $0x28] sm:$0xff] %v744_v23  ;;  %v745_v6 = vmul.f32 %v734_v3, %v1260_v11 }
 0x38c   : > { %v736_v7 = vpop.f32.mrf.mxu1 }
 0x38d   : > { %753 = vst [vmem:[%s297_s15 + $0x30] sm:$0xff] %v745_v6  ;;  %v746_v9 = vmul.f32 %v736_v7, %v1256_v10 }
 0x38f   : > { %754 = vst [vmem:[%s297_s15 + $0x38] sm:$0xff] %v746_v9 }
 0x390   : > { %1018 = shalt.err (!%p1015_p10)
}
 0x391   : > { %s1019_s16 = scalar_lea.hbm %s1333_s19, 1024  ;;  %s1023_s15 = scalar_lea.hbm %s1384_s7, 2048 }
 0x392   : > { %p1020_p0 = scmp.ne.s32.totalorder %s1333_s19, %s1019_s16  ;;  %p1024_p1 = scmp.lt.s32.totalorder %s1333_s19, %s1384_s7 }
 0x393   : > { %p1025_p3 = scmp.lt.s32.totalorder %s1023_s15, %s1019_s16 }
 0x394   : > { %p1021_p2 = pnand %p1020_p0, %p1393_p12 }
 0x395   : > { %p1026_p6 = por %p1025_p3, %p1024_p1 }
 0x396   : > { %p1022_p9 = pneg %p1021_p2 }
 0x398   : > { %p1027_p11 = pnand %p1026_p6, %p1022_p9 }
 0x39a   : > { %1030 = shalt.err (!%p1027_p11)
}
 0x39b   : > { %s1078_s29 = smov 256   ;;  %s1079_s21 = smov 16  }
 0x39c   : > { %908 = dma.vmem_to_hbm [thread:$0]  (%p1393_p12), %s1327_s22, 1024, %s1333_s19, %s756_s28, %s1078_s29, %s1078_s29, %s1079_s21  }
 0x39d PF: > { %s785_s12 = sand.u32 1, %s1057_s24   ;;  %p1394_p13 = scmp.ne.s32.totalorder %s1390_s14, 0 }
 0x39e   : > { %p1395_p4 = scmp.ge.s32.totalorder %s1069_s27, 2  ;;  %s786_s9 = scalar_lea.sflag [#allocation4], %s785_s12 }
 0x3a0   : > { %p915_p5 = pnand %p1395_p4, %p1394_p13 }
 0x3a2   : > { %p916_p7 = pneg %p915_p5 }
 0x3a4   : > { %1052 = dma.done.wait (%p916_p7), %s786_s9, 1024  }
 0x3a5   : > { %1054 = vsyncadd (%p916_p7), %s786_s9, 4294966272  ;;  %p20_p8 = scmp.ge.s32.totalorder %s1145_s30, 4   ;;  %s1396_s24 = smov %s1061_s25 }
 0x3a6   : > { %s1397_s25 = smov %s1065_s26  ;;  %s1398_s26 = smov %s1157_s10 }
 0x3a7   : > { %s1399_s27 = smov %s1145_s30  ;;  %22 = sbr.rel (!%p20_p8) target bundleno = 5 (0x5), region = 93 }
 0x3ac   :  { %791 = vsyncpa [#allocation3], 1 }
 0x3ad   :  { %793 = vsyncpa [#allocation3 + $0x1], 1 }
 0x3ae   :  { %794 = vsyncpa [#allocation4], 1 }
 0x3af   :  { %796 = vsyncpa [#allocation4 + $0x1], 1 }

</bundles_post_ra>
